<compile_context>
chip_gen: v7x
topology: tpu7x:2x2x1
jax: 0.10.0
libtpu: 0.0.40
codegen_flags: <defaults>
</compile_context>

<pallas_src>
import jax
import jax.numpy as jnp
from jax import lax
from jax.experimental import pallas as pl
from jax.experimental.pallas import tpu as pltpu

KAPPA = 8
INPUT_SIZE = (KAPPA + 1) * 2     # 18
HIDDEN_SIZE = 64
OUTPUT_SIZE = 1

LANE = 128                       # TPU lane width
SUB_ROWS = 512                   # inner sub-block rows (h = (512, 64) f32)
MEGACORE_QUANTUM = 1024          # multi-tile tiles stay multiples of this so the
                                 # (tm//128, 128) out block keeps 8-aligned sublanes
DEFAULT_TM = 8192                # batch-tile rows (multiple of MEGACORE_QUANTUM)


def _round_up(n, m):
    return ((n + m - 1) // m) * m


def _cdiv(a, b):
    return -(-a // b)


def _select_tm(batch, tm_max=DEFAULT_TM):
    """Pick the batch tile size (rows per grid step)."""
    assert tm_max % MEGACORE_QUANTUM == 0
    b = _round_up(max(batch, 1), LANE)
    if b <= SUB_ROWS:
        return b                                    # tiny batch: one small tile
    if b > tm_max:
        return tm_max                               # large batch: many max-size tiles
    if b >= 2 * MEGACORE_QUANTUM:
        # Mid-size batch: force >= 2 tiles so both v7x TensorCores get work.
        return _round_up(_cdiv(b, 2), MEGACORE_QUANTUM)
    return _round_up(b, SUB_ROWS)                   # single mid-size tile


def critic_kernel(x_ref, w1_ref, b1_ref, w2_ref, b2_ref, o_ref):
    tm = x_ref.shape[0]                 # static tile rows
    sub = min(SUB_ROWS, tm)             # inner sub-block rows (tm % sub == 0)
    n_sub = tm // sub
    g_sub = sub // LANE                 # output rows per sub-block

    # Weights/biases are resident in VMEM across the whole grid (constant
    # index_map); load them once per tile.
    w1 = w1_ref[...]                    # (18, 64)
    b1 = b1_ref[...]                    # (1, 64)
    w2 = w2_ref[...]                    # (1, 64)
    b2 = b2_ref[0, 0]                   # scalar bias from SMEM

    def body(s, carry):
        r0 = pl.multiple_of(s * sub, sub)
        xs = x_ref[pl.ds(r0, sub), :]                                   # (sub, 18)
        # Layer 1 on the MXU, f32 accumulation. K=18 intentionally unpadded.
        h = jnp.dot(xs, w1, preferred_element_type=jnp.float32)         # (sub, 64)
        h = jnp.maximum(h + b1, 0.0)                                    # bias + ReLU (VPU)
        # Layer 2 (output width 1): VPU multiply + lane reduction instead of a
        # 1-wide MXU pass. Splitting the row axis first (free major-dim
        # reshape) makes the reduced result (g_sub, 128) lane-dense so the
        # store is an unmasked full-lane vst.
        prod = h * w2                                                   # (sub, 64)
        out = jnp.sum(prod.reshape(g_sub, LANE, HIDDEN_SIZE), axis=-1) + b2
        o0 = pl.multiple_of(s * g_sub, g_sub)
        o_ref[pl.ds(o0, g_sub), :] = out.astype(o_ref.dtype)
        return carry

    lax.fori_loop(0, n_sub, body, 0, unroll=True)


def critic_forward(x, w1, b1, w2_row, b2, *, tm_max=DEFAULT_TM):
    """x: (B, 18) f32 -> (B, 1) f32."""
    B = x.shape[0]
    tm = _select_tm(B, tm_max)
    sub = min(SUB_ROWS, tm)
    assert tm % LANE == 0 and tm % sub == 0
    n_tiles = _cdiv(B, tm)              # ragged last tile: OOB reads are padded,
    g = tm // LANE                      # garbage rows are sliced off below.

    out = pl.pallas_call(
        critic_kernel,
        out_shape=jax.ShapeDtypeStruct((n_tiles * g, LANE), jnp.float32),
        grid=(n_tiles,),
        in_specs=[
            pl.BlockSpec((tm, INPUT_SIZE), lambda i: (i, 0)),            # x tile
            pl.BlockSpec((INPUT_SIZE, HIDDEN_SIZE), lambda i: (0, 0)),   # W1 (resident)
            pl.BlockSpec((1, HIDDEN_SIZE), lambda i: (0, 0)),            # b1 (resident)
            pl.BlockSpec((1, HIDDEN_SIZE), lambda i: (0, 0)),            # W2 row (resident)
            pl.BlockSpec(memory_space=pltpu.MemorySpace.SMEM),           # b2 scalar
        ],
        out_specs=pl.BlockSpec((g, LANE), lambda i: (i, 0)),             # lane-dense out
        compiler_params=pltpu.CompilerParams(
            dimension_semantics=("parallel",),
            vmem_limit_bytes=32 * 1024 * 1024,
        ),
    )(x, w1, b1, w2_row, b2)

    # Row-major flatten of the (n_tiles*g, 128) slab recovers batch order.
    return out.reshape(-1)[:B].reshape(B, OUTPUT_SIZE)


def init_params(key):
    """Deterministic init mimicking PyTorch nn.Linear default
    (uniform in [-1/sqrt(fan_in), 1/sqrt(fan_in)]).

    Returns W1:(18,64), b1:(1,64), W2 stored as a (1,64) row, b2:(1,1)."""
    k1, k2, k3, k4 = jax.random.split(key, 4)
    bound1 = 1.0 / jnp.sqrt(jnp.float32(INPUT_SIZE))
    bound2 = 1.0 / jnp.sqrt(jnp.float32(HIDDEN_SIZE))
    w1 = jax.random.uniform(k1, (INPUT_SIZE, HIDDEN_SIZE), jnp.float32,
                            -bound1, bound1)
    b1 = jax.random.uniform(k2, (1, HIDDEN_SIZE), jnp.float32, -bound1, bound1)
    w2_row = jax.random.uniform(k3, (1, HIDDEN_SIZE), jnp.float32,
                                -bound2, bound2)
    b2 = jax.random.uniform(k4, (1, OUTPUT_SIZE), jnp.float32, -bound2, bound2)
    return w1, b1, w2_row, b2


def critic_reference(x, w1, b1, w2_row, b2):
    h = jnp.maximum(x @ w1 + b1, 0.0)
    return h @ w2_row.T + b2


if __name__ == "__main__":
    key = jax.random.PRNGKey(0)
    kx, kp, kx2 = jax.random.split(key, 3)

    w1, b1, w2_row, b2 = init_params(kp)

    # Small batch (matches the module's typical use).
    batch = 8
    x = jax.random.normal(kx, (batch, INPUT_SIZE), jnp.float32)
    out = jax.block_until_ready(critic_forward(x, w1, b1, w2_row, b2))
    ref = critic_reference(x, w1, b1, w2_row, b2)
    assert out.shape == (batch, OUTPUT_SIZE)
    assert jnp.allclose(out, ref, atol=1e-4, rtol=1e-4), "mismatch vs reference"

    # Non-multiple-of-lane batch to exercise the ragged (un-padded) path.
    batch2 = 50
    x2 = jax.random.normal(kx2, (batch2, INPUT_SIZE), jnp.float32)
    out2 = jax.block_until_ready(critic_forward(x2, w1, b1, w2_row, b2))
    ref2 = critic_reference(x2, w1, b1, w2_row, b2)
    assert out2.shape == (batch2, OUTPUT_SIZE)
    assert jnp.allclose(out2, ref2, atol=1e-4, rtol=1e-4), "mismatch vs reference"

    print("KERNEL_OK")
</pallas_src>

<mosaic_0001>
module attributes {stable_mosaic.version = 11 : i64} {
  func.func @critic_kernel(%arg0: i32, %arg1: memref<128x18xf32, #tpu.memory_space<vmem>>, %arg2: memref<18x64xf32, #tpu.memory_space<vmem>>, %arg3: memref<1x64xf32, #tpu.memory_space<vmem>>, %arg4: memref<1x64xf32, #tpu.memory_space<vmem>>, %arg5: memref<1x1xf32, #tpu.memory_space<smem>>, %arg6: memref<1x128xf32, #tpu.memory_space<vmem>>) attributes {dimension_semantics = [#tpu.dimension_semantics<parallel>], iteration_bounds = array<i64: 1>, scalar_prefetch = 0 : i64, scratch_operands = 0 : i64, tpu.core_type = #tpu.core_type<tc>, window_params = [{transform_indices = @transform_0, window_bounds = array<i64: 128, 18>}, {pipeline_mode = #tpu.pipeline_mode<synchronous>, transform_indices = @transform_1, window_bounds = array<i64: 18, 64>}, {pipeline_mode = #tpu.pipeline_mode<synchronous>, transform_indices = @transform_2, window_bounds = array<i64: 1, 64>}, {pipeline_mode = #tpu.pipeline_mode<synchronous>, transform_indices = @transform_3, window_bounds = array<i64: 1, 64>}, {transform_indices = @transform_4, window_bounds = array<i64: 1, 1>}, {transform_indices = @transform_5, window_bounds = array<i64: 1, 128>}]} {
    %c0 = arith.constant 0 : index
    %c0_0 = arith.constant 0 : index
    %0 = vector.load %arg2[%c0, %c0_0] : memref<18x64xf32, #tpu.memory_space<vmem>>, vector<18x64xf32>
    %c0_1 = arith.constant 0 : index
    %c0_2 = arith.constant 0 : index
    %1 = vector.load %arg3[%c0_1, %c0_2] : memref<1x64xf32, #tpu.memory_space<vmem>>, vector<1x64xf32>
    %c0_3 = arith.constant 0 : index
    %c0_4 = arith.constant 0 : index
    %2 = vector.load %arg4[%c0_3, %c0_4] : memref<1x64xf32, #tpu.memory_space<vmem>>, vector<1x64xf32>
    %c0_5 = arith.constant 0 : index
    %c0_6 = arith.constant 0 : index
    %3 = memref.load %arg5[%c0_5, %c0_6] : memref<1x1xf32, #tpu.memory_space<smem>>
    %c0_i32 = arith.constant 0 : i32
    %c128_i32 = arith.constant 128 : i32
    %4 = arith.muli %c0_i32, %c128_i32 : i32
    %5 = tpu.assume_multiple %4, 128 : i32
    %6 = arith.index_cast %5 : i32 to index
    %c0_7 = arith.constant 0 : index
    %7 = vector.load %arg1[%6, %c0_7] : memref<128x18xf32, #tpu.memory_space<vmem>>, vector<128x18xf32>
    %cst = arith.constant dense<0.000000e+00> : vector<128x64xf32>
    %8 = tpu.matmul %7, %0, %cst {dimension_numbers = #tpu.dot_dimension_numbers<[1], [0], [0], [1], [0, 0, 1, 1], [], []>} : vector<128x18xf32>, vector<18x64xf32>, vector<128x64xf32> -> vector<128x64xf32>
    %9 = vector.broadcast %1 : vector<1x64xf32> to vector<128x64xf32>
    %10 = arith.addf %8, %9 : vector<128x64xf32>
    %cst_8 = arith.constant 0.000000e+00 : f32
    %11 = vector.broadcast %cst_8 : f32 to vector<128x64xf32>
    %12 = arith.maximumf %10, %11 : vector<128x64xf32>
    %13 = vector.broadcast %2 : vector<1x64xf32> to vector<128x64xf32>
    %14 = arith.mulf %12, %13 : vector<128x64xf32>
    %15 = vector.shape_cast %14 : vector<128x64xf32> to vector<1x128x64xf32>
    %cst_9 = arith.constant dense<0.000000e+00> : vector<1x128xf32>
    %16 = vector.multi_reduction <add>, %15, %cst_9 [2] : vector<1x128x64xf32> to vector<1x128xf32>
    %17 = vector.broadcast %3 : f32 to vector<1x128xf32>
    %18 = arith.addf %16, %17 : vector<1x128xf32>
    %c1_i32 = arith.constant 1 : i32
    %19 = arith.muli %c0_i32, %c1_i32 : i32
    %20 = tpu.assume_multiple %19, 1 : i32
    %21 = arith.index_cast %20 : i32 to index
    %c0_10 = arith.constant 0 : index
    %22 = vector.load %arg6[%21, %c0_10] : memref<1x128xf32, #tpu.memory_space<vmem>>, vector<1x128xf32>
    tpu.vector_store %arg6[%21, %c0_10], %18 {strides = array<i32>} : memref<1x128xf32, #tpu.memory_space<vmem>>, vector<1x128xf32>,
    %c1_i32_11 = arith.constant 1 : i32
    return
  }
  func.func @transform_0(%arg0: i32) -> (i32, i32) {
    %c0_i32 = arith.constant 0 : i32
    %c0_i32_0 = arith.constant 0 : i32
    return %arg0, %c0_i32 : i32, i32
  }
  func.func @transform_1(%arg0: i32) -> (i32, i32) {
    %c0_i32 = arith.constant 0 : i32
    %c0_i32_0 = arith.constant 0 : i32
    %c0_i32_1 = arith.constant 0 : i32
    return %c0_i32, %c0_i32_0 : i32, i32
  }
  func.func @transform_2(%arg0: i32) -> (i32, i32) {
    %c0_i32 = arith.constant 0 : i32
    %c0_i32_0 = arith.constant 0 : i32
    %c0_i32_1 = arith.constant 0 : i32
    return %c0_i32, %c0_i32_0 : i32, i32
  }
  func.func @transform_3(%arg0: i32) -> (i32, i32) {
    %c0_i32 = arith.constant 0 : i32
    %c0_i32_0 = arith.constant 0 : i32
    %c0_i32_1 = arith.constant 0 : i32
    return %c0_i32, %c0_i32_0 : i32, i32
  }
  func.func @transform_4(%arg0: i32) -> (i32, i32) {
    %c0_i32 = arith.constant 0 : i32
    %c0_i32_0 = arith.constant 0 : i32
    %c0_i32_1 = arith.constant 0 : i32
    return %c0_i32, %c0_i32_0 : i32, i32
  }
  func.func @transform_5(%arg0: i32) -> (i32, i32) {
    %c0_i32 = arith.constant 0 : i32
    %c0_i32_0 = arith.constant 0 : i32
    return %arg0, %c0_i32 : i32, i32
  }
}

</mosaic_0001>

<bundles_post_ra>
// kernel: tpu_custom_call.1
= control target key start
LH: loop header
LB: loop body
LE: loop exit
PB: predicated region body
PF: predicated region fallthrough
CT: control target
= control target key end

     0   :  { %11 = vsyncpa [#allocation4], 0  ;;  %s905_s0 = inlined_call_operand.hbm [shape: f32[8,18], index: 0, kind: input, shape index: {}]   ;;  %s906_s1 = inlined_call_operand.hbm [shape: f32[18,64], index: 1, kind: input, shape index: {}]   ;;  %s907_s2 = inlined_call_operand.vmem [shape: f32[1,64], index: 2, kind: input, shape index: {}]   ;;  %s908_s3 = inlined_call_operand.vmem [shape: f32[1,64], index: 3, kind: input, shape index: {}]   ;;  %s909_s4 = inlined_call_operand.<no memory space> [shape: f32[1,1], index: 4, kind: input, shape index: {}]   ;;  %s910_s5 = inlined_call_operand.hbm [shape: f32[1,128], index: 5, kind: output, shape index: {}]  }
   0x1   :  { %12 = vsyncpa [#allocation7], 0 }
   0x2   :  { %13 = vsyncpa [#allocation5], 0 }
   0x3   :  { %18 = vsyncadd [#allocation4], 1920  ;;  %s678_s18 = smov [#allocation3]   ;;  %s606_s22 = scalar_lea.hbm %s905_s0, 128 }
   0x4   :  { %s19_s19 = sshll.u32 %s678_s18, 4  ;;  %p607_p0 = scmp.ne.s32.totalorder %s905_s0, %s606_s22  ;;  %s20_s19 = int_to_ptr.vmem [resolvable:$true] %s19_s19 }
   0x5   :  { %p610_p1 = scmp.lt.u32.totalorder %s606_s22, %s905_s0 }
   0x7   :  { %p612_p2 = pnand %p610_p1, %p607_p0 }
   0x9   :  { %615 = shalt.err (!%p612_p2)
}
   0xa   :  { %s616_s27 = scalar_lea.vmem %s20_s19, 128  ;;  %s620_s28 = scalar_lea.vmem %s20_s19, 2048 }
   0xb   :  { %p617_p3 = scmp.ne.s32.totalorder %s20_s19, %s616_s27  ;;  %p621_p4 = scmp.lt.s32.totalorder %s20_s19, %s20_s19 }
   0xc   :  { %p622_p5 = scmp.lt.s32.totalorder %s620_s28, %s616_s27 }
   0xe   :  { %p623_p6 = por %p622_p5, %p621_p4 }
  0x10   :  { %p624_p7 = pnand %p623_p6, %p617_p3 }
  0x12   :  { %627 = shalt.err (!%p624_p7)
}
  0x13   :  { %s679_s29 = smov 128   ;;  %s680_s30 = smov 8  }
  0x14   :  { %25 = dma.hbm_to_vmem [thread:$0]  %s905_s0, 128, %s20_s19, [#allocation4], %s679_s29, %s679_s29, %s680_s30  }
  0x15   :  { %s681_s8 = smov [#allocation6]   ;;  %s628_s12 = scalar_lea.hbm %s906_s1, 384 }
  0x16   :  { %s31_s9 = sshll.u32 %s681_s8, 4  ;;  %p629_p8 = scmp.ne.s32.totalorder %s906_s1, %s628_s12  ;;  %s32_s9 = int_to_ptr.vmem [resolvable:$true] %s31_s9 }
  0x17   :  { %p632_p9 = scmp.lt.u32.totalorder %s628_s12, %s906_s1 }
  0x19   :  { %p634_p10 = pnand %p632_p9, %p629_p8 }
  0x1b   :  { %637 = shalt.err (!%p634_p10)
}
  0x1c   :  { %s638_s17 = scalar_lea.vmem %s32_s9, 384  ;;  %p643_p12 = scmp.lt.s32.totalorder %s32_s9, %s32_s9 }
  0x1d   :  { %p639_p11 = scmp.ne.s32.totalorder %s32_s9, %s638_s17  ;;  %p644_p13 = scmp.lt.s32.totalorder %s638_s17, %s638_s17 }
  0x1f   :  { %p645_p0 = por %p644_p13, %p643_p12 }
  0x21   :  { %p646_p1 = pnand %p645_p0, %p639_p11 }
  0x23   :  { %649 = shalt.err (!%p646_p1)
}
  0x24   :  { %37 = dma.hbm_to_vmem [thread:$0]  %s906_s1, 384, %s32_s9, [#allocation7], %s679_s29, %s679_s29, %s680_s30  }
  0x25   :  { %672 = dma.done.wait [#allocation4], 2048  }
  0x26   :  { %673 = vsyncadd [#allocation4], 4294965248 }
  0x27   :  { %674 = dma.done.wait [#allocation7], 384  }
  0x28   :  { %675 = vsyncadd [#allocation7], 4294966912  ;;  %vm78_vm0 = vcmask 146432   ;;  %v50_v0 = vld [vmem:[#allocation6] sm:$0xff]  ;;  %v51_v1 = vld [vmem:[#allocation6 + $0x8] sm:$0xff]  ;;  %vm127_vm1 = vcmask 1041408  }
  0x29   :  { %v593_v2 = vpack.c.bf16 %v51_v1, %v50_v0  ;;  %v56_v3 = vld [vmem:[#allocation3] sm:$0xff]  ;;  %v52_v5 = vld [vmem:[#allocation6 + $0x10] sm:$0x3]  ;;  %v57_v6 = vld [vmem:[#allocation3 + $0x8] sm:$0xff]  ;;  %vm314_vm2 = vcmask 523264   ;;  %vm407_vm3 = vcmask 130112  }
  0x2a   :  { %v64_v4 = vld [vmem:[#allocation3 + $0x40] sm:$0xff]  ;;  %569 = vmatprep.mubr.msk.f32.mxu0 %vm78_vm0, %v56_v3  ;;  %v65_v7 = vld [vmem:[#allocation3 + $0x48] sm:$0xff]  ;;  %v58_v8 = vld [vmem:[#allocation3 + $0x10] sm:$0xff]  ;;  %vm414_vm4 = vcmask 195712   ;;  %vm421_vm5 = vcmask 261312   ;;  %vm428_vm6 = vcmask 326912  }
  0x2b   :  { %581 = vmatprep.mubr.msk.f32.mxu1 %vm78_vm0, %v64_v4  ;;  %594 = vmatprep.subr.bf16.mxu0 %v593_v2  ;;  %v66_v9 = vld [vmem:[#allocation3 + $0x50] sm:$0xff]  ;;  %v59_v10 = vld [vmem:[#allocation3 + $0x18] sm:$0xff]  ;;  %v60_v12 = vld [vmem:[#allocation3 + $0x20] sm:$0xff]  ;;  %vm435_vm7 = vcmask 392512   ;;  %vm442_vm8 = vcmask 458112   ;;  %vm449_vm9 = vcmask 523712  }
  0x2c   :  { %597 = vmatprep.subr.bf16.mxu1 %v593_v2  ;;  %596 = vmatpush3.bf16.msra.mxu0 %v593_v2  ;;  %v67_v11 = vld [vmem:[#allocation3 + $0x58] sm:$0xff]  ;;  %v68_v13 = vld [vmem:[#allocation3 + $0x60] sm:$0xff]  ;;  %v61_v14 = vld [vmem:[#allocation3 + $0x28] sm:$0xff]  ;;  %vm456_vm10 = vcmask 589312   ;;  %vm463_vm11 = vcmask 654912   ;;  %vm470_vm12 = vcmask 720512  }
  0x2d   :  { %599 = vmatpush3.bf16.msra.mxu1 %v593_v2  ;;  %567 = vmatprep.subr.msk.mxu0 %vm127_vm1, %v52_v5  ;;  %v69_v15 = vld [vmem:[#allocation3 + $0x68] sm:$0xff]  ;;  %v62_v16 = vld [vmem:[#allocation3 + $0x30] sm:$0xff]  ;;  %v63_v18 = vld [vmem:[#allocation3 + $0x38] sm:$0xff]  ;;  %vm477_vm13 = vcmask 786112   ;;  %vm484_vm14 = vcmask 851712   ;;  %vm491_vm15 = vcmask 917312  }
  0x2e   :  { %598 = vmatprep.subr.msk.mxu1 %vm127_vm1, %v52_v5  ;;  %v70_v17 = vld [vmem:[#allocation3 + $0x70] sm:$0xff]  ;;  %v71_v19 = vld [vmem:[#allocation3 + $0x78] sm:$0xff]  ;;  %v756_v20 = vld [vmem:[%s907_s2] ss:$0 sm:$0xff] }
  0x2f   :  { %v765_v29 = vld [vmem:[%s908_s3] ss:$0 sm:$0xff] }
  0x30   :  { %568 = vmatpush3.msk.msra.mxu0 %vm127_vm1, %v52_v5 }
  0x31   :  { %600 = vmatpush3.msk.msra.mxu1 %vm127_vm1, %v52_v5  ;;  %570 = vmatmul.mubr.msk.f32.vlgmr.msra.gmra.mrb[0].mxu0 %vm78_vm0, %v57_v6  ;;  %vm505_vm1 = vcmask 1048512  }
  0x32   :  { %582 = vmatmul.mubr.msk.f32.vlgmr.msra.gmra.mrb[0].mxu1 %vm78_vm0, %v65_v7  ;;  %572 = vmatprep.mubr.msk.f32.mxu0 %vm78_vm0, %v58_v8 }
  0x33   :  { %584 = vmatprep.mubr.msk.f32.mxu1 %vm78_vm0, %v66_v9 }
  0x35   :  { %573 = vmatmul.mubr.msk.f32.gmra.mrb[2].mxu0 %vm78_vm0, %v59_v10 }
  0x36   :  { %585 = vmatmul.mubr.msk.f32.gmra.mrb[2].mxu1 %vm78_vm0, %v67_v11  ;;  %575 = vmatprep.mubr.msk.f32.mxu0 %vm78_vm0, %v60_v12 }
  0x37   :  { %587 = vmatprep.mubr.msk.f32.mxu1 %vm78_vm0, %v68_v13 }
  0x39   :  { %576 = vmatmul.mubr.msk.f32.gmra.mrb[4].mxu0 %vm78_vm0, %v61_v14 }
  0x3a   :  { %588 = vmatmul.mubr.msk.f32.gmra.mrb[4].mxu1 %vm78_vm0, %v69_v15  ;;  %578 = vmatprep.mubr.msk.f32.mxu0 %vm78_vm0, %v62_v16 }
  0x3b   :  { %590 = vmatprep.mubr.msk.f32.mxu1 %vm78_vm0, %v70_v17 }
  0x3d   :  { %579 = vmatmul.mubr.msk.f32.gmra.mrb[6].mxu0 %vm78_vm0, %v63_v18 }
  0x3e   :  { %591 = vmatmul.mubr.msk.f32.gmra.mrb[6].mxu1 %vm78_vm0, %v71_v19  ;;  %vm498_vm0 = vcmask 982912  }
 0x104   :  { %v571_v21 = vpop.f32.mrb[0].mxu0 }
 0x105   :  { %v583_v22 = vpop.f32.mrb[0].mxu1  ;;  %v203_v23 = vadd.f32 %v571_v21, %v756_v20  ;;  %v197_v25 = vpop.f32.mrb[1].mxu0 }
 0x106   :  { %v243_v24 = vadd.f32 %v583_v22, %v756_v20  ;;  %v237_v26 = vpop.f32.mrb[1].mxu1  ;;  %v198_v27 = vadd.f32 %v756_v20, %v197_v25 }
 0x107   :  { %v238_v28 = vadd.f32 %v756_v20, %v237_v26  ;;  %v277_v30 = vmax.f32 %v203_v23, 0.0 }
 0x108   :  { %v285_v31 = vmax.f32 %v243_v24, 0.0  ;;  %v276_v32 = vmax.f32 %v198_v27, 0.0  ;;  %v574_v33 = vpop.f32.mrb[2].mxu0 }
 0x109   :  { %v586_v34 = vpop.f32.mrb[2].mxu1  ;;  %v213_v35 = vadd.f32 %v574_v33, %v756_v20  ;;  %v207_v36 = vpop.f32.mrb[3].mxu0  ;;  %v299_v39 = vmul.f32 %v765_v29, %v277_v30  ;;  %v284_v41 = vmax.f32 %v238_v28, 0.0 }
 0x10a   :  { %v307_v37 = vmul.f32 %v765_v29, %v285_v31  ;;  %v253_v38 = vadd.f32 %v586_v34, %v756_v20  ;;  %v247_v40 = vpop.f32.mrb[3].mxu1  ;;  %v208_v42 = vadd.f32 %v756_v20, %v207_v36  ;;  %v298_v44 = vmul.f32 %v765_v29, %v276_v32 }
 0x10b   :  { %v248_v43 = vadd.f32 %v756_v20, %v247_v40  ;;  %v279_v45 = vmax.f32 %v213_v35, 0.0  ;;  %v318_v48 = vsel %vm314_vm2, %v299_v39, 0.0  ;;  %v306_v57 = vmul.f32 %v765_v29, %v284_v41 }
 0x10c   :  { %v342_v46 = vsel %vm314_vm2, %v307_v37, 0.0  ;;  %v287_v47 = vmax.f32 %v253_v38, 0.0  ;;  %319 = vadd.xlane.f32.xlu0 %v318_v48  ;;  %v577_v49 = vpop.f32.mrb[4].mxu0  ;;  %v278_v58 = vmax.f32 %v208_v42, 0.0  ;;  %v315_v61 = vsel %vm314_vm2, %v298_v44, 0.0 }
 0x10d   :  { %343 = vadd.xlane.f32.xlu1 %v342_v46  ;;  %v589_v50 = vpop.f32.mrb[4].mxu1  ;;  %v301_v51 = vmul.f32 %v765_v29, %v279_v45  ;;  %v223_v52 = vadd.f32 %v577_v49, %v756_v20  ;;  %v217_v53 = vpop.f32.mrb[5].mxu0  ;;  %v286_v59 = vmax.f32 %v248_v43, 0.0  ;;  %v339_v7 = vsel %vm314_vm2, %v306_v57, 0.0 }
 0x10e   :  { %v309_v54 = vmul.f32 %v765_v29, %v287_v47  ;;  %v257_v55 = vpop.f32.mrb[5].mxu1  ;;  %v218_v56 = vadd.f32 %v756_v20, %v217_v53  ;;  %v300_v8 = vmul.f32 %v765_v29, %v278_v58  ;;  %v263_v10 = vadd.f32 %v589_v50, %v756_v20 }
 0x10f   :  { %v324_v60 = vsel %vm314_vm2, %v301_v51, 0.0  ;;  %v281_v0 = vmax.f32 %v223_v52, 0.0  ;;  %v308_v9 = vmul.f32 %v765_v29, %v286_v59  ;;  %v258_v11 = vadd.f32 %v756_v20, %v257_v55 }
 0x110   :  { %316 = vadd.xlane.f32.xlu0 %v315_v61  ;;  %v580_v62 = vpop.f32.mrb[6].mxu0  ;;  %v280_v1 = vmax.f32 %v218_v56, 0.0  ;;  %v348_v2 = vsel %vm314_vm2, %v309_v54, 0.0  ;;  %v321_v16 = vsel %vm314_vm2, %v300_v8, 0.0  ;;  %v289_v18 = vmax.f32 %v263_v10, 0.0 }
 0x111   :  { %325 = vadd.xlane.f32.xlu1 %v324_v60  ;;  %v592_v63 = vpop.f32.mrb[6].mxu1  ;;  %v233_v3 = vadd.f32 %v580_v62, %v756_v20  ;;  %v227_v4 = vpop.f32.mrb[7].mxu0  ;;  %v303_v14 = vmul.f32 %v765_v29, %v281_v0  ;;  %v345_v17 = vsel %vm314_vm2, %v308_v9, 0.0  ;;  %v288_v19 = vmax.f32 %v258_v11, 0.0 }
 0x112   :  { %v267_v5 = vpop.f32.mrb[7].mxu1  ;;  %v228_v6 = vadd.f32 %v756_v20, %v227_v4  ;;  %v302_v15 = vmul.f32 %v765_v29, %v280_v1  ;;  %v273_v21 = vadd.f32 %v592_v63, %v756_v20  ;;  %v311_v27 = vmul.f32 %v765_v29, %v289_v18 }
 0x113   :  { %v283_v12 = vmax.f32 %v233_v3, 0.0  ;;  %v268_v22 = vadd.f32 %v756_v20, %v267_v5  ;;  %v330_v23 = vsel %vm314_vm2, %v303_v14, 0.0  ;;  %v310_v28 = vmul.f32 %v765_v29, %v288_v19 }
 0x114   :  { %340 = vadd.xlane.f32.xlu0 %v339_v7  ;;  %v282_v13 = vmax.f32 %v228_v6, 0.0  ;;  %v327_v24 = vsel %vm314_vm2, %v302_v15, 0.0  ;;  %v291_v30 = vmax.f32 %v273_v21, 0.0  ;;  %v354_v33 = vsel %vm314_vm2, %v311_v27, 0.0 }
 0x115   :  { %349 = vadd.xlane.f32.xlu1 %v348_v2  ;;  %v305_v25 = vmul.f32 %v765_v29, %v283_v12  ;;  %v290_v31 = vmax.f32 %v268_v22, 0.0  ;;  %v351_v34 = vsel %vm314_vm2, %v310_v28, 0.0  ;;  %v396_v39 = vlaneseq }
 0x116   :  { %v304_v26 = vmul.f32 %v765_v29, %v282_v13  ;;  %v313_v35 = vmul.f32 %v765_v29, %v291_v30  ;;  %v821_v46 = vstv %s909_s4  ;;  %s682_s4 = smov [#allocation8]  }
 0x117   :  { %v336_v32 = vsel %vm314_vm2, %v305_v25, 0.0  ;;  %v312_v36 = vmul.f32 %v765_v29, %v290_v31  ;;  %v813_v42 = vand.u32 127, %v396_v39  ;;  %v815_v45 = vshrl.u32 %v396_v39, 7  ;;  %s515_s22 = sshll.u32 %s682_s4, 4  ;;  %s516_s22 = int_to_ptr.vmem [resolvable:$true] %s515_s22 }
 0x118   :  { %346 = vadd.xlane.f32.xlu0 %v345_v17  ;;  %v333_v20 = vsel %vm314_vm2, %v304_v26, 0.0  ;;  %v360_v37 = vsel %vm314_vm2, %v313_v35, 0.0  ;;  %s650_s23 = scalar_lea.vmem %s516_s22, 16  ;;  %s654_s24 = scalar_lea.vmem %s516_s22, 32 }
 0x119   :  { %322 = vadd.xlane.f32.xlu1 %v321_v16  ;;  %v357_v38 = vsel %vm314_vm2, %v312_v36, 0.0  ;;  %v402_v29 = vadd.s32 4294967288, %v813_v42  ;;  %v409_v47 = vadd.s32 4294967280, %v813_v42  ;;  %v400_v48 = vsub.s32 %v813_v42, %v815_v45  ;;  %p651_p2 = scmp.ne.s32.totalorder %s516_s22, %s650_s23  ;;  %p655_p3 = scmp.lt.s32.totalorder %s516_s22, %s516_s22 }
 0x11a   :  { %v830_v52 = vadd.s32 4294967224, %v813_v42  ;;  %v416_v53 = vadd.s32 4294967272, %v813_v42  ;;  %v836_v56 = vadd.s32 4294967232, %v813_v42  ;;  %v423_v58 = vadd.s32 4294967264, %v813_v42  ;;  %p656_p4 = scmp.lt.s32.totalorder %s654_s24, %s650_s23 }
 0x11b   :  { %v405_v54 = vsub.s32 %v402_v29, %v815_v45  ;;  %v412_v57 = vsub.s32 %v409_v47, %v815_v45  ;;  %v841_v60 = vadd.s32 4294967208, %v813_v42  ;;  %v844_v62 = vadd.s32 4294967216, %v813_v42 }
 0x11c   :  { %328 = vadd.xlane.f32.xlu0 %v327_v24  ;;  %v430_v0 = vadd.s32 4294967256, %v813_v42  ;;  %v461_v1 = vsub.s32 %v830_v52, %v815_v45  ;;  %v419_v2 = vsub.s32 %v416_v53, %v815_v45  ;;  %v444_v6 = vadd.s32 4294967240, %v813_v42  ;;  %p657_p5 = por %p656_p4, %p655_p3 }
 0x11d   :  { %331 = vadd.xlane.f32.xlu1 %v330_v23  ;;  %v454_v7 = vsub.s32 %v836_v56, %v815_v45  ;;  %v426_v9 = vsub.s32 %v423_v58, %v815_v45  ;;  %v437_v10 = vadd.s32 4294967248, %v813_v42  ;;  %v475_v12 = vsub.s32 %v841_v60, %v815_v45 }
 0x11e   :  { %v468_v13 = vsub.s32 %v844_v62, %v815_v45  ;;  %v433_v14 = vsub.s32 %v430_v0, %v815_v45  ;;  %v447_v22 = vsub.s32 %v444_v6, %v815_v45  ;;  %v486_v23 = vadd.s32 4294967192, %v813_v42  ;;  %p658_p6 = pnand %p657_p5, %p651_p2 }
 0x11f   :  { %v440_v25 = vsub.s32 %v437_v10, %v815_v45  ;;  %v479_v31 = vadd.s32 4294967200, %v813_v42 }
 0x120   :  { %334 = vadd.xlane.f32.xlu0 %v333_v20  ;;  %v489_v36 = vsub.s32 %v486_v23, %v815_v45 }
 0x121   :  { %337 = vadd.xlane.f32.xlu1 %v336_v32 }
 0x124   :  { %352 = vadd.xlane.f32.xlu0 %v351_v34 }
 0x125   :  { %355 = vadd.xlane.f32.xlu1 %v354_v33 }
 0x128   :  { %358 = vadd.xlane.f32.xlu0 %v357_v38 }
 0x129   :  { %361 = vadd.xlane.f32.xlu1 %v360_v37  ;;  %v500_v37 = vadd.s32 4294967176, %v813_v42 }
 0x12b   :  { %v503_v56 = vsub.s32 %v500_v37, %v815_v45 }
 0x199   :  { %v320_v41 = vpop.xlane.xlu0 %319 }
 0x19a   :  { %v811_v40 = vpop.xlane.xlu1 %343  ;;  %v365_v55 = vadd.f32 %v821_v46, %v320_v41 }
 0x19b   :  { %v373_v35 = vadd.f32 %v821_v46, %v811_v40  ;;  %v482_v40 = vsub.s32 %v479_v31, %v815_v45 }
 0x19c   :  { %v406_v4 = vrot.slane %v365_v55, %v405_v54 }
 0x19d   :  { %v317_v44 = vpop.xlane.xlu0 %316  ;;  %v462_v53 = vrot.slane %v373_v35, %v461_v1 }
 0x19e   :  { %v326_v43 = vpop.xlane.xlu1 %325  ;;  %v364_v49 = vadd.f32 %v821_v46, %v317_v44 }
 0x19f   :  { %v367_v5 = vadd.f32 %v821_v46, %v326_v43  ;;  %v493_v43 = vadd.s32 4294967184, %v813_v42 }
 0x1a0   :  { %v401_v59 = vrot.slane %v364_v49, %v400_v48 }
 0x1a1   :  { %v341_v51 = vpop.xlane.xlu0 %340  ;;  %v420_v21 = vrot.slane %v367_v5, %v419_v2 }
 0x1a2   :  { %v827_v50 = vpop.xlane.xlu1 %349  ;;  %v408_v11 = vsel %vm407_vm3, %v406_v4, %v401_v59  ;;  %v372_v32 = vadd.f32 %v821_v46, %v341_v51 }
 0x1a3   :  { %v375_v44 = vadd.f32 %v821_v46, %v827_v50 }
 0x1a4   :  { %v455_v49 = vrot.slane %v372_v32, %v454_v7 }
 0x1a5   :  { %v347_v63 = vpop.xlane.xlu0 %346  ;;  %v476_v58 = vrot.slane %v375_v44, %v475_v12 }
 0x1a6   :  { %v323_v61 = vpop.xlane.xlu1 %322  ;;  %v374_v38 = vadd.f32 %v821_v46, %v347_v63 }
 0x1a7   :  { %v366_v3 = vadd.f32 %v821_v46, %v323_v61 }
 0x1a8   :  { %v469_v50 = vrot.slane %v374_v38, %v468_v13 }
 0x1a9   :  { %v413_v8 = vrot.slane %v366_v3, %v412_v57  ;;  %v329_v16 = vpop.xlane.xlu0 %328  ;;  %v496_v57 = vsub.s32 %v493_v43, %v815_v45 }
 0x1aa   :  { %v332_v15 = vpop.xlane.xlu1 %331  ;;  %v368_v19 = vadd.f32 %v821_v46, %v329_v16 }
 0x1ab   :  { %v415_v17 = vsel %vm414_vm4, %v413_v8, %v408_v11  ;;  %v369_v18 = vadd.f32 %v821_v46, %v332_v15 }
 0x1ac   :  { %v427_v24 = vrot.slane %v368_v19, %v426_v9  ;;  %v422_v27 = vsel %vm421_vm5, %v420_v21, %v415_v17 }
 0x1ad   :  { %v434_v26 = vrot.slane %v369_v18, %v433_v14  ;;  %v335_v30 = vpop.xlane.xlu0 %334 }
 0x1ae   :  { %v338_v28 = vpop.xlane.xlu1 %337  ;;  %v429_v20 = vsel %vm428_vm6, %v427_v24, %v422_v27  ;;  %v370_v34 = vadd.f32 %v821_v46, %v335_v30 }
 0x1af   :  { %v371_v33 = vadd.f32 %v821_v46, %v338_v28  ;;  %v436_v29 = vsel %vm435_vm7, %v434_v26, %v429_v20 }
 0x1b0   :  { %v441_v41 = vrot.slane %v370_v34, %v440_v25 }
 0x1b1   :  { %v448_v39 = vrot.slane %v371_v33, %v447_v22  ;;  %v353_v48 = vpop.xlane.xlu0 %352 }
 0x1b2   :  { %v356_v47 = vpop.xlane.xlu1 %355  ;;  %v443_v51 = vsel %vm442_vm8, %v441_v41, %v436_v29  ;;  %v376_v52 = vadd.f32 %v821_v46, %v353_v48 }
 0x1b3   :  { %v450_v54 = vsel %vm449_vm9, %v448_v39, %v443_v51  ;;  %v377_v42 = vadd.f32 %v821_v46, %v356_v47 }
 0x1b4   :  { %v457_v55 = vsel %vm456_vm10, %v455_v49, %v450_v54  ;;  %v483_v63 = vrot.slane %v376_v52, %v482_v40 }
 0x1b5   :  { %v464_v59 = vsel %vm463_vm11, %v462_v53, %v457_v55  ;;  %v359_v61 = vpop.xlane.xlu0 %358  ;;  %v490_v2 = vrot.slane %v377_v42, %v489_v36 }
 0x1b6   :  { %v362_v60 = vpop.xlane.xlu1 %361  ;;  %v471_v62 = vsel %vm470_vm12, %v469_v50, %v464_v59  ;;  %v378_v1 = vadd.f32 %v821_v46, %v359_v61 }
 0x1b7   :  { %v379_v0 = vadd.f32 %v821_v46, %v362_v60  ;;  %v478_v3 = vsel %vm477_vm13, %v476_v58, %v471_v62 }
 0x1b8   :  { %v485_v45 = vsel %vm484_vm14, %v483_v63, %v478_v3  ;;  %v497_v5 = vrot.slane %v378_v1, %v496_v57 }
 0x1b9   :  { %v504_v4 = vrot.slane %v379_v0, %v503_v56  ;;  %v492_v6 = vsel %vm491_vm15, %v490_v2, %v485_v45 }
 0x1ba   :  { %v499_v7 = vsel %vm498_vm0, %v497_v5, %v492_v6 }
 0x1bb   :  { %v506_v8 = vsel %vm505_vm1, %v504_v4, %v499_v7 }
 0x1bc   :  { %508 = vst [vmem:[#allocation8] sm:$0x1] %v506_v8 }
 0x1bd   :  { %661 = shalt.err (!%p658_p6)
}
 0x1be   :  { %s662_s27 = scalar_lea.hbm %s910_s5, 16 }
 0x1bf   :  { %p663_p7 = scmp.ne.s32.totalorder %s910_s5, %s662_s27  ;;  %p666_p8 = scmp.lt.u32.totalorder %s662_s27, %s910_s5 }
 0x1c1   :  { %p668_p9 = pnand %p666_p8, %p663_p7 }
 0x1c3   :  { %671 = shalt.err (!%p668_p9)
}
 0x1c4   :  { %518 = dma.vmem_to_hbm [thread:$0]  %s516_s22, 16, %s910_s5, [#allocation5]  }
 0x1c5   :  { %676 = dma.done.wait [#allocation5], 16  }
 0x1c6   :  { %677 = vsyncadd [#allocation5], 4294967280 }
 0x1c7   :  { %522 = vsyncpa [#allocation4], 1 }
 0x1c8   :  { %523 = vsyncpa [#allocation7], 1 }
 0x1c9   :  { %524 = vsyncpa [#allocation5], 1 }

</bundles_post_ra>
